<compile_context>
chip_gen: v6e
topology: v6e:2x2x1
jax: 0.10.0
libtpu: 0.0.40
codegen_flags: <defaults>
</compile_context>

<pallas_src>
import functools

import jax
import jax.numpy as jnp
from jax.experimental import pallas as pl
from jax.experimental.pallas import tpu as pltpu


# ---------------------------------------------------------------------------
# helpers
# ---------------------------------------------------------------------------

def _round_up(x, m):
    return ((x + m - 1) // m) * m


def _mxu_supports_int8():
    """v5e/v6e MXUs have an int8 path; v7x is bf16/fp8 only."""
    try:
        kind = jax.devices()[0].device_kind.lower()
    except Exception:
        return True
    return ("7" not in kind)


# ---------------------------------------------------------------------------
# kernels
# ---------------------------------------------------------------------------

def _quantize_kernel(scales_ref, x_ref, x8_ref):
    """Dynamic per-tensor activation quantization: x8 = clip(round(x * 127/clampv))."""
    inv_scale = scales_ref[0]                       # 127 / clampv (SMEM scalar)
    x8_ref[...] = jnp.clip(jnp.round(x_ref[...] * inv_scale),
                           -128.0, 127.0).astype(jnp.int8)


def _matmul_fullk_kernel(scales_ref, x8_ref, wt_ref, bq_ref, qs_ref, o_ref,
                         *, use_int8_mxu):
    """Grid (M/tm, N/tn); full K per block -> no accumulator scratch, no k branches."""
    alpha = scales_ref[1]                           # clampv / 127
    if use_int8_mxu:
        acc = jnp.dot(x8_ref[...], wt_ref[...],
                      preferred_element_type=jnp.int32).astype(jnp.float32)
    else:
        # v7x: no integer MXU path -> bf16 matmul with f32 accumulation.
        acc = jnp.dot(x8_ref[...].astype(jnp.bfloat16),
                      wt_ref[...].astype(jnp.bfloat16),
                      preferred_element_type=jnp.float32)
    # linear_a8_w8_bbf16_obf16: bf16 intermediate BEFORE the per-channel rescale.
    lin = (acc * alpha + bq_ref[...]).astype(jnp.bfloat16)
    o_ref[...] = lin * qs_ref[...]


def _matmul_ktiled_kernel(scales_ref, x8_ref, wt_ref, bq_ref, qs_ref, o_ref, acc_ref,
                          *, use_int8_mxu):
    """Grid (M/tm, N/tn, K/tk) with a resident accumulator over the K axis."""
    k = pl.program_id(2)

    @pl.when(k == 0)
    def _():
        acc_ref[...] = jnp.zeros_like(acc_ref)

    if use_int8_mxu:
        acc_ref[...] += jnp.dot(x8_ref[...], wt_ref[...],
                                preferred_element_type=jnp.int32)
    else:
        acc_ref[...] += jnp.dot(x8_ref[...].astype(jnp.bfloat16),
                                wt_ref[...].astype(jnp.bfloat16),
                                preferred_element_type=jnp.float32)

    @pl.when(k == pl.num_programs(2) - 1)
    def _():
        alpha = scales_ref[1]
        lin = (acc_ref[...].astype(jnp.float32) * alpha + bq_ref[...]).astype(jnp.bfloat16)
        o_ref[...] = lin * qs_ref[...]


# ---------------------------------------------------------------------------
# one-time weight preparation (hoisted out of the forward path)
# ---------------------------------------------------------------------------

def prepare_qlinear_params(weight_int8, bias, qscales, *, full_k_max=2048, tile_k=512):
    """Transpose/pad the int8 weight and precompute epilogue constants ONCE."""
    out_features, in_features = weight_int8.shape
    N, K = out_features, in_features

    # K padding / tiling choice.
    if K <= full_k_max:
        Kp = _round_up(K, 128)
        tk = Kp                     # single K block -> no accumulator path
    else:
        Kp = _round_up(K, tile_k)
        tk = tile_k

    # N padding / tile (256 fills the v6e 2x256x256 MXU; 128-aligned for v5e).
    Np = _round_up(N, 128)
    tn = 256 if Np % 256 == 0 else 128

    wt = weight_int8.T.astype(jnp.int8)                      # (K, N), done once
    if Kp != K or Np != N:
        wt = jnp.zeros((Kp, Np), jnp.int8).at[:K, :N].set(wt)

    qs_f32 = qscales.reshape(-1).astype(jnp.float32)
    qs_pad = jnp.ones((Np,), jnp.float32).at[:N].set(qs_f32)  # pad with 1 (avoid /0)

    if bias is None:
        b_pad = jnp.zeros((Np,), jnp.float32)
    else:
        b_pad = jnp.zeros((Np,), jnp.float32).at[:N].set(bias.reshape(-1).astype(jnp.float32))

    bias_over_qs = (b_pad / qs_pad).reshape(1, Np)            # precomputed epilogue term
    qs_row = qs_pad.astype(jnp.bfloat16).reshape(1, Np)       # per-out-channel rescale

    return dict(wt=wt, bias_over_qs=bias_over_qs, qs_row=qs_row,
                N=N, K=K, Np=Np, Kp=Kp, tn=tn, tk=tk)


# ---------------------------------------------------------------------------
# forward
# ---------------------------------------------------------------------------

def qlinear_a8w8_forward(x, params, *, use_int8_mxu=None):
    if use_int8_mxu is None:
        use_int8_mxu = _mxu_supports_int8()

    N, K, Np, Kp = params["N"], params["K"], params["Np"], params["Kp"]
    tn, tk = params["tn"], params["tk"]
    wt, bias_over_qs, qs_row = params["wt"], params["bias_over_qs"], params["qs_row"]

    out_shape = x.shape[:-1] + (N,)
    x2 = x.reshape(-1, x.shape[-1]).astype(jnp.float32)
    M = x2.shape[0]

    # clampv = input.max() (dynamic per-tensor) -- computed on the *unpadded* data.
    clampv = jnp.max(x2).astype(jnp.float32)
    scales = jnp.stack([127.0 / clampv, clampv / 127.0]).astype(jnp.float32)  # (2,) SMEM

    # Bounded M tile (keeps VMEM small on v7x and gives the megacore parallel blocks).
    if M <= 512:
        Mp = _round_up(M, 8)
        tm = Mp
    else:
        tm = 256
        Mp = _round_up(M, tm)

    if Mp != M or Kp != K:
        x2 = jnp.pad(x2, ((0, Mp - M), (0, Kp - K)))

    # ---- pass 1: quantize activations once (f32 -> int8), pure VPU, tiny -----------
    x8 = pl.pallas_call(
        _quantize_kernel,
        out_shape=jax.ShapeDtypeStruct((Mp, Kp), jnp.int8),
        grid_spec=pltpu.PrefetchScalarGridSpec(
            num_scalar_prefetch=1,
            grid=(Mp // tm, Kp // tk),
            in_specs=[pl.BlockSpec((tm, tk), lambda i, k, s: (i, k))],
            out_specs=pl.BlockSpec((tm, tk), lambda i, k, s: (i, k)),
        ),
        compiler_params=pltpu.CompilerParams(
            dimension_semantics=("parallel", "parallel")),
    )(scales, x2)

    # ---- pass 2: int8 matmul + fused epilogue ---------------------------------------
    grid_k = Kp // tk
    if grid_k == 1:
        kernel = functools.partial(_matmul_fullk_kernel, use_int8_mxu=use_int8_mxu)
        out = pl.pallas_call(
            kernel,
            out_shape=jax.ShapeDtypeStruct((Mp, Np), jnp.bfloat16),
            grid_spec=pltpu.PrefetchScalarGridSpec(
                num_scalar_prefetch=1,
                grid=(Mp // tm, Np // tn),
                in_specs=[
                    pl.BlockSpec((tm, Kp), lambda i, j, s: (i, 0)),    # x8 (int8)
                    pl.BlockSpec((Kp, tn), lambda i, j, s: (0, j)),    # weight.T (int8)
                    pl.BlockSpec((1, tn), lambda i, j, s: (0, j)),     # bias/qscales (f32)
                    pl.BlockSpec((1, tn), lambda i, j, s: (0, j)),     # qscales (bf16)
                ],
                out_specs=pl.BlockSpec((tm, tn), lambda i, j, s: (i, j)),
            ),
            compiler_params=pltpu.CompilerParams(
                dimension_semantics=("parallel", "parallel")),
        )(scales, x8, wt, bias_over_qs, qs_row)
    else:
        kernel = functools.partial(_matmul_ktiled_kernel, use_int8_mxu=use_int8_mxu)
        acc_dtype = jnp.int32 if use_int8_mxu else jnp.float32
        out = pl.pallas_call(
            kernel,
            out_shape=jax.ShapeDtypeStruct((Mp, Np), jnp.bfloat16),
            grid_spec=pltpu.PrefetchScalarGridSpec(
                num_scalar_prefetch=1,
                grid=(Mp // tm, Np // tn, grid_k),
                in_specs=[
                    pl.BlockSpec((tm, tk), lambda i, j, k, s: (i, k)),
                    pl.BlockSpec((tk, tn), lambda i, j, k, s: (k, j)),
                    pl.BlockSpec((1, tn), lambda i, j, k, s: (0, j)),
                    pl.BlockSpec((1, tn), lambda i, j, k, s: (0, j)),
                ],
                out_specs=pl.BlockSpec((tm, tn), lambda i, j, k, s: (i, j)),
                scratch_shapes=[pltpu.VMEM((tm, tn), acc_dtype)],
            ),
            compiler_params=pltpu.CompilerParams(
                dimension_semantics=("parallel", "parallel", "arbitrary")),
        )(scales, x8, wt, bias_over_qs, qs_row)

    if Mp != M or Np != N:
        out = out[:M, :N]
    return out.reshape(out_shape)


# ---------------------------------------------------------------------------
# pure-JAX reference (identical semantics) for validation
# ---------------------------------------------------------------------------

def _reference(x, weight_int8, bias, qscales):
    out_features, _ = weight_int8.shape
    out_shape = x.shape[:-1] + (out_features,)
    x2 = x.reshape(-1, x.shape[-1]).astype(jnp.float32)
    clampv = jnp.max(x2)
    x8 = jnp.clip(jnp.round(x2 * (127.0 / clampv)), -128.0, 127.0).astype(jnp.int32)
    acc = x8 @ weight_int8.T.astype(jnp.int32)
    qs = qscales.reshape(1, -1)
    lin = (acc.astype(jnp.float32) * (clampv / 127.0)
           + bias.reshape(1, -1).astype(jnp.float32) / qs.astype(jnp.float32)
           ).astype(jnp.bfloat16)
    out = lin * qs.astype(jnp.bfloat16)
    return out.reshape(out_shape)


if __name__ == "__main__":
    # Small shapes consistent with the module: x (batch=2, seq=8, in_features=128),
    # out_features=256.
    batch, seq = 2, 8
    in_features, out_features = 128, 256

    key = jax.random.PRNGKey(0)
    kx, kw, kb, ks = jax.random.split(key, 4)

    x = jax.random.normal(kx, (batch, seq, in_features), dtype=jnp.float32)
    # Deterministic synthetic "checkpoint": int8 weight, f32 bias, bf16 per-channel scales.
    weight_int8 = jax.random.randint(kw, (out_features, in_features), -127, 128,
                                     dtype=jnp.int32).astype(jnp.int8)
    bias = 0.1 * jax.random.normal(kb, (out_features,), dtype=jnp.float32)
    qscales = (0.01 + 0.01 * jax.random.uniform(ks, (out_features, 1),
                                                dtype=jnp.float32)).astype(jnp.bfloat16)
    # TODO(synk): training-path (backward hooks, GradientQTensor, ResidualTensor, CUDA
    # 3-fold residual quant) is backward-only bookkeeping and is not part of forward.

    # One-time weight prep (transpose, pad, epilogue constants) -- not in the hot path.
    params = prepare_qlinear_params(weight_int8, bias, qscales)

    out = qlinear_a8w8_forward(x, params)
    out = jax.block_until_ready(out)

    ref = _reference(x, weight_int8, bias, qscales)
    assert out.shape == (batch, seq, out_features) and out.dtype == jnp.bfloat16
    assert jnp.allclose(out.astype(jnp.float32), ref.astype(jnp.float32),
                        rtol=2e-2, atol=2e-2)
    print("KERNEL_OK")
</pallas_src>

<mosaic_0001>
module attributes {stable_mosaic.version = 11 : i64} {
  func.func @_quantize_kernel(%arg0: i32, %arg1: i32, %arg2: memref<2xf32, #tpu.memory_space<smem>>, %arg3: memref<16x128xf32, #tpu.memory_space<vmem>>, %arg4: memref<16x128xi8, #tpu.memory_space<vmem>>) attributes {dimension_semantics = [#tpu.dimension_semantics<parallel>, #tpu.dimension_semantics<parallel>], iteration_bounds = array<i64: 1, 1>, scalar_prefetch = 1 : i64, scratch_operands = 0 : i64, tpu.core_type = #tpu.core_type<tc>, window_params = [{transform_indices = @transform_0, window_bounds = array<i64: 16, 128>}, {transform_indices = @transform_1, window_bounds = array<i64: 16, 128>}]} {
    %c0 = arith.constant 0 : index
    %0 = memref.load %arg2[%c0] : memref<2xf32, #tpu.memory_space<smem>>
    %c0_0 = arith.constant 0 : index
    %c0_1 = arith.constant 0 : index
    %1 = vector.load %arg3[%c0_0, %c0_1] : memref<16x128xf32, #tpu.memory_space<vmem>>, vector<16x128xf32>
    %2 = vector.broadcast %0 : f32 to vector<16x128xf32>
    %3 = arith.mulf %1, %2 : vector<16x128xf32>
    %4 = math.roundeven %3 : vector<16x128xf32>
    %cst = arith.constant -1.280000e+02 : f32
    %cst_2 = arith.constant 1.270000e+02 : f32
    %5 = vector.broadcast %cst : f32 to vector<16x128xf32>
    %6 = arith.maximumf %5, %4 : vector<16x128xf32>
    %7 = vector.broadcast %cst_2 : f32 to vector<16x128xf32>
    %8 = arith.minimumf %7, %6 : vector<16x128xf32>
    %9 = arith.fptosi %8 : vector<16x128xf32> to vector<16x128xi8>
    %c0_3 = arith.constant 0 : index
    %c0_4 = arith.constant 0 : index
    %10 = vector.load %arg4[%c0_3, %c0_4] : memref<16x128xi8, #tpu.memory_space<vmem>>, vector<16x128xi8>
    tpu.vector_store %arg4[%c0_3, %c0_4], %9 {strides = array<i32>} : memref<16x128xi8, #tpu.memory_space<vmem>>, vector<16x128xi8>,
    return
  }
  func.func @transform_0(%arg0: i32, %arg1: i32, %arg2: memref<2xf32, #tpu.memory_space<smem>>) -> (i32, i32) {
    %c0_i32 = arith.constant 0 : i32
    return %arg0, %arg1 : i32, i32
  }
  func.func @transform_1(%arg0: i32, %arg1: i32, %arg2: memref<2xf32, #tpu.memory_space<smem>>) -> (i32, i32) {
    %c0_i32 = arith.constant 0 : i32
    return %arg0, %arg1 : i32, i32
  }
}

</mosaic_0001>

<bundles_post_ra>
// kernel: tpu_custom_call.1
= control target key start
LH: loop header
LB: loop body
LE: loop exit
PB: predicated region body
PF: predicated region fallthrough
CT: control target
= control target key end

     0   :  { %s142_s9 = smov [#allocation3]   ;;  %s173_s0 = inlined_call_operand.hbm [shape: f32[2], index: 0, kind: input, shape index: {}]   ;;  %s174_s1 = inlined_call_operand.hbm [shape: f32[16,128], index: 1, kind: input, shape index: {}]   ;;  %s175_s2 = inlined_call_operand.hbm [shape: s8[16,128], index: 2, kind: output, shape index: {}]  }
   0x1   :  { %8 = dma.hbm_to_smem %s173_s0, 16, %s142_s9, [#allocation2] }
   0x2   :  { %136 = dma.done.wait [#allocation2], 16 }
   0x3   :  { %137 = vsyncadd [#allocation2], 4294967280 }
   0x4   :  { %10 = sfence }
   0x5   :  { %11 = vsyncpa [#allocation5], 0 }
   0x6   :  { %12 = vsyncpa [#allocation6], 0  ;;  %s143_s12 = smov [#allocation4]  }
   0x7   :  { %s18_s13 = sshll.u32 %s143_s12, 4  ;;  %s19_s13 = int_to_ptr.vmem [resolvable:$true] %s18_s13 }
   0x8   :  { %s104_s14 = scalar_lea.vmem %s19_s13, 256  ;;  %p109_p1 = scmp.lt.s32.totalorder %s19_s13, %s19_s13 }
   0x9   :  { %p105_p0 = scmp.ne.s32.totalorder %s19_s13, %s104_s14  ;;  %p110_p2 = scmp.lt.s32.totalorder %s104_s14, %s104_s14 }
   0xb   :  { %p111_p3 = por %p110_p2, %p109_p1 }
   0xd   :  { %p112_p4 = pnand %p111_p3, %p105_p0 }
   0xf   :  { %115 = shalt.err (!%p112_p4)
}
  0x10   :  { %s144_s15 = smov 128   ;;  %s145_s16 = smov 8  }
  0x11   :  { %24 = dma.hbm_to_vmem [thread:$0]  %s174_s1, 256, %s19_s13, [#allocation5], %s144_s15, %s144_s15, %s145_s16  }
  0x12   :  { %138 = dma.done.wait [#allocation5], 256  }
  0x13   :  { %139 = vsyncadd [#allocation5], 4294967040  ;;  %s28_s0 = sld [smem:[#allocation3]]  ;;  %v29_v0 = vld [vmem:[#allocation4] sm:$0xff]  ;;  %v30_v2 = vld [vmem:[#allocation4 + $0x8] sm:$0xff]  ;;  %s146_s19 = smov [#allocation7]  }
  0x14   :  { %s57_s20 = sshll.u32 %s146_s19, 4  ;;  %s58_s20 = int_to_ptr.vmem [resolvable:$true] %s57_s20 }
  0x15   :  { %s116_s1 = scalar_lea.vmem %s58_s20, 64  ;;  %p121_p6 = scmp.lt.s32.totalorder %s58_s20, %s58_s20 }
  0x16   :  { %p117_p5 = scmp.ne.s32.totalorder %s58_s20, %s116_s1  ;;  %p122_p7 = scmp.lt.s32.totalorder %s116_s1, %s116_s1 }
  0x18   :  { %p123_p8 = por %p122_p7, %p121_p6 }
  0x19   :  { %v31_v1 = vstv %s28_s0 }
  0x1a   :  { %v32_v3 = vmul.f32 %v31_v1, %v29_v0  ;;  %v33_v4 = vmul.f32 %v31_v1, %v30_v2  ;;  %p124_p9 = pnand %p123_p8, %p117_p5 }
  0x1c   :  { %v71_v5 = vclampa-f32 %v32_v3, -128, 127  ;;  %v73_v6 = vclampa-f32 %v33_v4, -128, 127 }
  0x1e   :  { %v77_v7 = vcvt.f32.s32 %v71_v5  ;;  %v80_v8 = vcvt.f32.s32 %v73_v6 }
  0x20   :  { %v46_v9 = vpack.c.b16 %v77_v7, %v77_v7  ;;  %v48_v10 = vpack.c.b16 %v80_v8, %v80_v8 }
  0x22   :  { %v47_v11 = vpack.c.b8 %v46_v9, %v46_v9  ;;  %v49_v12 = vpack.c.b8 %v48_v10, %v48_v10 }
  0x24   :  { %50 = vst [vmem:[#allocation7] sm:$0x3] %v47_v11  ;;  %51 = vst [vmem:[#allocation7 + $0x2] sm:$0x3] %v49_v12 }
  0x25   :  { %127 = shalt.err (!%p124_p9)
}
  0x26   :  { %s147_s21 = smov 32   ;;  %s148_s22 = smov 2  }
  0x27   :  { %63 = dma.vmem_to_hbm [thread:$0]  %s58_s20, 64, %s175_s2, [#allocation6], %s147_s21, %s147_s21, %s148_s22  }
  0x28   :  { %140 = dma.done.wait [#allocation6], 64  }
  0x29   :  { %141 = vsyncadd [#allocation6], 4294967232 }
  0x2a   :  { %67 = vsyncpa [#allocation5], 1 }
  0x2b   :  { %68 = vsyncpa [#allocation6], 1 }

</bundles_post_ra>
